<compile_context>
chip_gen: v7x
topology: tpu7x:2x2x1
jax: 0.10.0
libtpu: 0.0.40
codegen_flags: <defaults>
</compile_context>

<pallas_src>
import functools

import jax
import jax.numpy as jnp
from jax.experimental import pallas as pl
from jax.experimental.pallas import tpu as pltpu


def _avgpool_kernel(x_ref, p_ref, o_ref, *, inv_k2):
    # x_ref: (TM, H*W)   p_ref: (H*W, Ho*Wo)   o_ref: (TM, Ho*Wo)
    acc = jnp.dot(x_ref[...], p_ref[...], preferred_element_type=jnp.float32)
    o_ref[...] = (acc * inv_k2).astype(o_ref.dtype)


def _pooling_matrix(H, W, k, dtype):
    """P[h*W + w, i*W_out + j] = 1 iff (h//k, w//k) == (i, j).  Exact in any dtype."""
    H_out, W_out = H // k, W // k
    hw = jnp.arange(H * W)
    h, w = hw // W, hw % W
    col = (h // k) * W_out + (w // k)                                  # (H*W,)
    onehot = col[:, None] == jnp.arange(H_out * W_out)[None, :]
    return onehot.astype(dtype)


@functools.lru_cache(maxsize=None)
def _device_info():
    """(tensorcores_per_chip, VMEM bytes per core) — heuristics for tile selection."""
    num_cores, vmem_bytes = 1, 128 << 20            # v5e / v6e defaults
    try:
        kind = jax.devices()[0].device_kind.lower()
    except Exception:
        kind = ""
    if "v7" in kind:
        num_cores, vmem_bytes = 2, 64 << 20
    elif "v4" in kind or "v5p" in kind:
        num_cores = 2
    try:
        vmem_bytes = int(pltpu.get_tpu_info().vmem_capacity_bytes)
    except Exception:
        pass
    return num_cores, vmem_bytes


def _probe_copy_kernel(x_ref, o_ref):
    o_ref[...] = x_ref[...]


@functools.lru_cache(maxsize=None)
def _single_buffered_constant_supported():
    """Probe whether pipeline_mode=pl.Buffered(1) compiles/runs on this jax/TPU."""
    try:
        spec = pl.BlockSpec((8, 128), lambda i: (0, 0), pipeline_mode=pl.Buffered(1))
        fn = pl.pallas_call(
            _probe_copy_kernel,
            out_shape=jax.ShapeDtypeStruct((8, 128), jnp.float32),
            grid_spec=pltpu.PrefetchScalarGridSpec(
                num_scalar_prefetch=0,
                grid=(1,),
                in_specs=[spec],
                out_specs=pl.BlockSpec((8, 128), lambda i: (0, 0)),
            ),
        )
        jax.block_until_ready(fn(jnp.zeros((8, 128), jnp.float32)))
        return True
    except Exception:
        return False


def _choose_tm(M, HW, HWo, itemsize, num_cores, budget_bytes, p_buffers):
    """Row tile TM: VMEM-budget-, generation- and dtype-min-tile-aware."""
    min_tm = {1: 32, 2: 16}.get(itemsize, 8)        # int8/fp8: 32, bf16: 16, f32: 8
    round_up = lambda v, m: ((v + m - 1) // m) * m

    # VMEM cap: double-buffered x & out blocks + resident P must fit the budget.
    per_row = 2 * (HW + HWo) * itemsize
    avail = max(budget_bytes - p_buffers * HW * HWo * itemsize, per_row * min_tm)
    cap = max(min_tm, (avail // per_row) // min_tm * min_tm)
    cap = min(cap, 1024)

    if num_cores <= 1:
        # Single TensorCore (v5e/v6e): splitting small problems only adds the
        # ~0.35 us per-step overhead. One block if it fits, else the largest tile
        # (which already gives >=3 steps of DMA/compute overlap on large M).
        if M <= cap:
            return round_up(M, min_tm)
        return min(512, cap)

    # 2 TensorCores (v7x): aim for >=3 pipelined steps per core on large M so the
    # x-tile DMA overlaps the matmul; at least one block per core on small M.
    tm = min(512, cap)
    while tm > 128 and tm // 2 >= min_tm and pl.cdiv(M, tm) < 3 * num_cores:
        tm //= 2
    tm = max(min_tm, (tm // min_tm) * min_tm)
    per_core = round_up(pl.cdiv(M, num_cores), min_tm)
    return max(min_tm, min(tm, per_core))


@functools.partial(jax.jit, static_argnums=(1,))
def avgpool2d_forward(x, kernel_size):
    """Forward pass of vnn.AvgPool2d.

    x      : (B, category_dim, C, H, W)
    returns: (B, category_dim, C, H // k, W // k)
    """
    B, cat, C, H, W = x.shape
    k = int(kernel_size)
    if H % k != 0 or W % k != 0:
        raise ValueError("kernel_size must evenly divide input width/height")
    H_out, W_out = H // k, W // k
    M = B * cat * C
    HW, HWo = H * W, H_out * W_out
    itemsize = x.dtype.itemsize

    num_cores, vmem_bytes = _device_info()
    budget = min(vmem_bytes // 2, 48 << 20)

    p_bytes = HW * HWo * itemsize
    if 2 * p_bytes > budget:
        # TODO(synk): separable (W-then-H) pooling matmuls for large feature maps.
        raise NotImplementedError(
            "AvgPool2d Pallas kernel: dense pooling matrix "
            f"({p_bytes / (1 << 20):.1f} MiB) exceeds the VMEM budget; spatial dims "
            "this large need the separable formulation.")

    single_buffer_p = _single_buffered_constant_supported()
    p_buffers = 1 if single_buffer_p else 2

    TM = _choose_tm(M, HW, HWo, itemsize, num_cores, budget, p_buffers)
    grid = (pl.cdiv(M, TM),)      # no jnp.pad: Pallas masks the ragged last block

    # Contiguous-axis collapses only (no transpose / pad): free under jit.
    x_flat = x.reshape(M, HW)
    # P holds exact 0/1 entries in x's native dtype (full-rate MXU path for bf16);
    # the exact 1/k^2 scale is applied to the f32 accumulator inside the kernel.
    P = _pooling_matrix(H, W, k, x.dtype)

    if single_buffer_p:
        p_spec = pl.BlockSpec((HW, HWo), lambda i: (0, 0),
                              pipeline_mode=pl.Buffered(1))
    else:
        p_spec = pl.BlockSpec((HW, HWo), lambda i: (0, 0))

    # VMEM actually used by this launch: double-buffered x/out blocks + resident P.
    need = 2 * TM * (HW + HWo) * itemsize + p_buffers * p_bytes
    vmem_limit = int(min(64 << 20, max(need + (8 << 20), 32 << 20)))

    out_flat = pl.pallas_call(
        functools.partial(_avgpool_kernel, inv_k2=1.0 / float(k * k)),
        out_shape=jax.ShapeDtypeStruct((M, HWo), x.dtype),
        grid_spec=pltpu.PrefetchScalarGridSpec(
            num_scalar_prefetch=0,
            grid=grid,
            in_specs=[
                pl.BlockSpec((TM, HW), lambda i: (i, 0)),   # activations, tiled over M
                p_spec,                                     # constant pooling matrix
            ],
            out_specs=pl.BlockSpec((TM, HWo), lambda i: (i, 0)),
        ),
        compiler_params=pltpu.CompilerParams(
            dimension_semantics=("parallel",),
            vmem_limit_bytes=vmem_limit,
        ),
    )(x_flat, P)

    return out_flat.reshape(B, cat, C, H_out, W_out)


def reference_forward(x, kernel_size):
    """Pure-JAX reference matching nn.AvgPool2d semantics from the module."""
    B, cat, C, H, W = x.shape
    k = kernel_size
    xr = x.reshape(B, cat, C, H // k, k, W // k, k)
    return xr.mean(axis=(4, 6))


if __name__ == "__main__":
    key = jax.random.PRNGKey(0)
    k1, k2 = jax.random.split(key)

    # Config 1: typical module usage (B, category_dim, C, H, W), k = 2.
    B, cat, C, H, W, ksz = 2, 4, 8, 16, 16, 2
    x = jax.random.normal(k1, (B, cat, C, H, W), jnp.float32)
    out = jax.block_until_ready(avgpool2d_forward(x, ksz))
    ref = reference_forward(x, ksz)
    assert out.shape == (B, cat, C, H // ksz, W // ksz), out.shape
    err = float(jnp.max(jnp.abs(out - ref)))
    if err > 1e-5:
        raise AssertionError(f"config1 mismatch vs reference, max abs err = {err}")

    # Config 2: k = 4 with M = 30 rows — exercises the ragged last block
    # (no pad, no output slice) and a narrower output block.
    B, cat, C, H, W, ksz = 2, 3, 5, 16, 16, 4
    x2 = jax.random.normal(k2, (B, cat, C, H, W), jnp.float32)
    out2 = jax.block_until_ready(avgpool2d_forward(x2, ksz))
    ref2 = reference_forward(x2, ksz)
    assert out2.shape == (B, cat, C, H // ksz, W // ksz), out2.shape
    err2 = float(jnp.max(jnp.abs(out2 - ref2)))
    if err2 > 1e-5:
        raise AssertionError(f"config2 mismatch vs reference, max abs err = {err2}")

    print("KERNEL_OK")
</pallas_src>

<mosaic_0001>
module attributes {stable_mosaic.version = 11 : i64} {
  func.func @_avgpool_kernel(%arg0: i32, %arg1: memref<64x256xf32, #tpu.memory_space<vmem>>, %arg2: memref<256x64xf32, #tpu.memory_space<vmem>>, %arg3: memref<64x64xf32, #tpu.memory_space<vmem>>) attributes {dimension_semantics = [#tpu.dimension_semantics<parallel>], iteration_bounds = array<i64: 1>, scalar_prefetch = 0 : i64, scratch_operands = 0 : i64, tpu.core_type = #tpu.core_type<tc>, window_params = [{transform_indices = @transform_0, window_bounds = array<i64: 64, 256>}, {pipeline_mode = #tpu.pipeline_mode<synchronous>, transform_indices = @transform_1, window_bounds = array<i64: 256, 64>}, {transform_indices = @transform_2, window_bounds = array<i64: 64, 64>}]} {
    %c0 = arith.constant 0 : index
    %c0_0 = arith.constant 0 : index
    %0 = vector.load %arg1[%c0, %c0_0] : memref<64x256xf32, #tpu.memory_space<vmem>>, vector<64x256xf32>
    %c0_1 = arith.constant 0 : index
    %c0_2 = arith.constant 0 : index
    %1 = vector.load %arg2[%c0_1, %c0_2] : memref<256x64xf32, #tpu.memory_space<vmem>>, vector<256x64xf32>
    %cst = arith.constant dense<0.000000e+00> : vector<64x64xf32>
    %2 = tpu.matmul %0, %1, %cst {dimension_numbers = #tpu.dot_dimension_numbers<[1], [0], [0], [1], [0, 0, 1, 1], [], []>} : vector<64x256xf32>, vector<256x64xf32>, vector<64x64xf32> -> vector<64x64xf32>
    %cst_3 = arith.constant 2.500000e-01 : f32
    %3 = vector.broadcast %cst_3 : f32 to vector<64x64xf32>
    %4 = arith.mulf %2, %3 : vector<64x64xf32>
    %c0_4 = arith.constant 0 : index
    %c0_5 = arith.constant 0 : index
    %5 = vector.load %arg3[%c0_4, %c0_5] : memref<64x64xf32, #tpu.memory_space<vmem>>, vector<64x64xf32>
    tpu.vector_store %arg3[%c0_4, %c0_5], %4 {strides = array<i32>} : memref<64x64xf32, #tpu.memory_space<vmem>>, vector<64x64xf32>,
    return
  }
  func.func @transform_0(%arg0: i32) -> (i32, i32) {
    %c0_i32 = arith.constant 0 : i32
    %c0_i32_0 = arith.constant 0 : i32
    return %arg0, %c0_i32 : i32, i32
  }
  func.func @transform_1(%arg0: i32) -> (i32, i32) {
    %c0_i32 = arith.constant 0 : i32
    %c0_i32_0 = arith.constant 0 : i32
    %c0_i32_1 = arith.constant 0 : i32
    return %c0_i32, %c0_i32_0 : i32, i32
  }
  func.func @transform_2(%arg0: i32) -> (i32, i32) {
    %c0_i32 = arith.constant 0 : i32
    %c0_i32_0 = arith.constant 0 : i32
    return %arg0, %c0_i32 : i32, i32
  }
}

</mosaic_0001>

<bundles_post_ra>
// kernel: avgpool2d_forward.1
= control target key start
LH: loop header
LB: loop body
LE: loop exit
PB: predicated region body
PF: predicated region fallthrough
CT: control target
= control target key end

     0   :  { %vm172_vm0 = vcmask 523264   ;;  %s480_s1 = inlined_call_operand.vmem [shape: f32[256,64], index: 1, kind: input, shape index: {}]   ;;  %s481_s0 = inlined_call_operand.vmem [shape: f32[64,256], index: 0, kind: input, shape index: {}]   ;;  %s482_s2 = inlined_call_operand.vmem [shape: f32[64,64], index: 2, kind: output, shape index: {}]  }
   0x1   :  { %v43_v0 = vld [vmem:[%s480_s1 + $0x80] sm:$0xff]  ;;  %v44_v1 = vld [vmem:[%s480_s1 + $0x88] sm:$0xff]  ;;  %v45_v5 = vld [vmem:[%s480_s1 + $0x90] sm:$0xff] }
   0x2   :  { %v27_v2 = vld [vmem:[%s480_s1] sm:$0xff]  ;;  %v241_v3 = vpack.c.bf16 %v44_v1, %v43_v0  ;;  %v28_v4 = vld [vmem:[%s480_s1 + $0x8] sm:$0xff]  ;;  %v46_v6 = vld [vmem:[%s480_s1 + $0x98] sm:$0xff] }
   0x3   :  { %v243_v7 = vpack.c.bf16 %v28_v4, %v27_v2  ;;  %v245_v8 = vpack.c.bf16 %v46_v6, %v45_v5  ;;  %v29_v9 = vld [vmem:[%s480_s1 + $0x10] sm:$0xff]  ;;  %v30_v10 = vld [vmem:[%s480_s1 + $0x18] sm:$0xff]  ;;  %v47_v11 = vld [vmem:[%s480_s1 + $0xa0] sm:$0xff] }
   0x4   :  { %242 = vmatprep.subr.bf16.mxu0 %v241_v3  ;;  %273 = vmatprep.subr.bf16.mxu1 %v241_v3  ;;  %v48_v12 = vld [vmem:[%s480_s1 + $0xa8] sm:$0xff]  ;;  %v247_v13 = vpack.c.bf16 %v30_v10, %v29_v9  ;;  %v31_v15 = vld [vmem:[%s480_s1 + $0x20] sm:$0xff]  ;;  %v49_v17 = vld [vmem:[%s480_s1 + $0xb0] sm:$0xff] }
   0x5   :  { %244 = vmatpush3.bf16.msra.mxu0 %v243_v7  ;;  %281 = vmatpush3.bf16.msra.mxu1 %v243_v7  ;;  %v249_v14 = vpack.c.bf16 %v48_v12, %v47_v11  ;;  %v32_v16 = vld [vmem:[%s480_s1 + $0x28] sm:$0xff]  ;;  %v50_v18 = vld [vmem:[%s480_s1 + $0xb8] sm:$0xff]  ;;  %v33_v21 = vld [vmem:[%s480_s1 + $0x30] sm:$0xff] }
   0x6   :  { %246 = vmatprep.subr.bf16.mxu0 %v245_v8  ;;  %274 = vmatprep.subr.bf16.mxu1 %v245_v8  ;;  %v251_v19 = vpack.c.bf16 %v32_v16, %v31_v15  ;;  %v253_v20 = vpack.c.bf16 %v50_v18, %v49_v17  ;;  %v34_v22 = vld [vmem:[%s480_s1 + $0x38] sm:$0xff]  ;;  %v51_v23 = vld [vmem:[%s480_s1 + $0xc0] sm:$0xff]  ;;  %v52_v24 = vld [vmem:[%s480_s1 + $0xc8] sm:$0xff] }
   0x7   :  { %v12_v25 = vld [vmem:[%s481_s0 + $0x8] sm:$0xff]  ;;  %v255_v27 = vpack.c.bf16 %v34_v22, %v33_v21  ;;  %v257_v28 = vpack.c.bf16 %v52_v24, %v51_v23  ;;  %v35_v29 = vld [vmem:[%s480_s1 + $0x40] sm:$0xff]  ;;  %v53_v31 = vld [vmem:[%s480_s1 + $0xd0] sm:$0xff] }
   0x8   :  { %123 = vmatprep.mubr.f32.mxu0 %v12_v25  ;;  %v20_v26 = vld [vmem:[%s481_s0 + $0x48] sm:$0xff]  ;;  %v54_v32 = vld [vmem:[%s480_s1 + $0xd8] sm:$0xff]  ;;  %v37_v35 = vld [vmem:[%s480_s1 + $0x50] sm:$0xff] }
   0x9   :  { %248 = vmatpush3.bf16.msra.mxu0 %v247_v13  ;;  %282 = vmatpush3.bf16.msra.mxu1 %v247_v13  ;;  %v36_v30 = vld [vmem:[%s480_s1 + $0x48] sm:$0xff]  ;;  %v261_v34 = vpack.c.bf16 %v54_v32, %v53_v31  ;;  %v38_v36 = vld [vmem:[%s480_s1 + $0x58] sm:$0xff]  ;;  %v55_v37 = vld [vmem:[%s480_s1 + $0xe0] sm:$0xff] }
   0xa   :  { %250 = vmatprep.subr.bf16.mxu0 %v249_v14  ;;  %275 = vmatprep.subr.bf16.mxu1 %v249_v14  ;;  %v259_v33 = vpack.c.bf16 %v36_v30, %v35_v29  ;;  %v56_v38 = vld [vmem:[%s480_s1 + $0xe8] sm:$0xff]  ;;  %v263_v39 = vpack.c.bf16 %v38_v36, %v37_v35  ;;  %v39_v41 = vld [vmem:[%s480_s1 + $0x60] sm:$0xff]  ;;  %v57_v43 = vld [vmem:[%s480_s1 + $0xf0] sm:$0xff] }
   0xb   :  { %143 = vmatprep.mubr.f32.mxu1 %v20_v26  ;;  %v265_v40 = vpack.c.bf16 %v56_v38, %v55_v37  ;;  %v40_v42 = vld [vmem:[%s480_s1 + $0x68] sm:$0xff]  ;;  %v58_v44 = vld [vmem:[%s480_s1 + $0xf8] sm:$0xff]  ;;  %v41_v47 = vld [vmem:[%s480_s1 + $0x70] sm:$0xff] }
   0xc   :  { %v267_v45 = vpack.c.bf16 %v40_v42, %v39_v41  ;;  %v269_v46 = vpack.c.bf16 %v58_v44, %v57_v43  ;;  %v42_v48 = vld [vmem:[%s480_s1 + $0x78] sm:$0xff]  ;;  %v11_v50 = vld [vmem:[%s481_s0] sm:$0xff]  ;;  %v13_v54 = vld [vmem:[%s481_s0 + $0x10] sm:$0xff] }
   0xd   :  { %252 = vmatpush3.bf16.msra.mxu0 %v251_v19  ;;  %283 = vmatpush3.bf16.msra.mxu1 %v251_v19  ;;  %v271_v49 = vpack.c.bf16 %v42_v48, %v41_v47  ;;  %v19_v51 = vld [vmem:[%s481_s0 + $0x40] sm:$0xff]  ;;  %v14_v52 = vld [vmem:[%s481_s0 + $0x18] sm:$0xff]  ;;  %v21_v55 = vld [vmem:[%s481_s0 + $0x50] sm:$0xff] }
   0xe   :  { %254 = vmatprep.subr.bf16.mxu0 %v253_v20  ;;  %276 = vmatprep.subr.bf16.mxu1 %v253_v20  ;;  %v22_v53 = vld [vmem:[%s481_s0 + $0x58] sm:$0xff]  ;;  %v16_v56 = vld [vmem:[%s481_s0 + $0x28] sm:$0xff]  ;;  %v15_v58 = vld [vmem:[%s481_s0 + $0x20] sm:$0xff] }
   0xf   :  { %v24_v57 = vld [vmem:[%s481_s0 + $0x68] sm:$0xff]  ;;  %v23_v59 = vld [vmem:[%s481_s0 + $0x60] sm:$0xff]  ;;  %v18_v60 = vld [vmem:[%s481_s0 + $0x38] sm:$0xff] }
  0x10   :  { %v26_v61 = vld [vmem:[%s481_s0 + $0x78] sm:$0xff]  ;;  %v17_v62 = vld [vmem:[%s481_s0 + $0x30] sm:$0xff] }
  0x11   :  { %256 = vmatpush3.bf16.msra.mxu0 %v255_v27  ;;  %284 = vmatpush3.bf16.msra.mxu1 %v255_v27  ;;  %v25_v63 = vld [vmem:[%s481_s0 + $0x70] sm:$0xff] }
  0x12   :  { %258 = vmatprep.subr.bf16.mxu0 %v257_v28  ;;  %277 = vmatprep.subr.bf16.mxu1 %v257_v28 }
  0x15   :  { %260 = vmatpush3.bf16.msra.mxu0 %v259_v33  ;;  %285 = vmatpush3.bf16.msra.mxu1 %v259_v33 }
  0x16   :  { %262 = vmatprep.subr.bf16.mxu0 %v261_v34  ;;  %278 = vmatprep.subr.bf16.mxu1 %v261_v34 }
  0x19   :  { %264 = vmatpush3.bf16.msra.mxu0 %v263_v39  ;;  %286 = vmatpush3.bf16.msra.mxu1 %v263_v39 }
  0x1a   :  { %266 = vmatprep.subr.bf16.mxu0 %v265_v40  ;;  %279 = vmatprep.subr.bf16.mxu1 %v265_v40 }
  0x1d   :  { %268 = vmatpush3.bf16.msra.mxu0 %v267_v45  ;;  %287 = vmatpush3.bf16.msra.mxu1 %v267_v45 }
  0x1e   :  { %270 = vmatprep.subr.bf16.mxu0 %v269_v46  ;;  %280 = vmatprep.subr.bf16.mxu1 %v269_v46 }
  0x21   :  { %272 = vmatpush3.bf16.msra.mxu0 %v271_v49  ;;  %288 = vmatpush3.bf16.msra.mxu1 %v271_v49 }
  0x24   :  { %124 = vmatmul.mubr.f32.vlgmr.msra.gmra.mrb[0].mxu0 %v11_v50  ;;  %144 = vmatmul.mubr.f32.vlgmr.msra.gmra.mrb[0].mxu1 %v19_v51 }
  0x25   :  { %128 = vmatprep.mubr.f32.mxu0 %v14_v52  ;;  %148 = vmatprep.mubr.f32.mxu1 %v22_v53 }
  0x28   :  { %129 = vmatmul.mubr.f32.gmra.mrb[2].mxu0 %v13_v54  ;;  %149 = vmatmul.mubr.f32.gmra.mrb[2].mxu1 %v21_v55 }
  0x29   :  { %133 = vmatprep.mubr.f32.mxu0 %v16_v56  ;;  %153 = vmatprep.mubr.f32.mxu1 %v24_v57 }
  0x2c   :  { %134 = vmatmul.mubr.f32.gmra.mrb[4].mxu0 %v15_v58  ;;  %154 = vmatmul.mubr.f32.gmra.mrb[4].mxu1 %v23_v59 }
  0x2d   :  { %138 = vmatprep.mubr.f32.mxu0 %v18_v60  ;;  %158 = vmatprep.mubr.f32.mxu1 %v26_v61 }
  0x30   :  { %139 = vmatmul.mubr.f32.gmra.mrb[6].mxu0 %v17_v62  ;;  %159 = vmatmul.mubr.f32.gmra.mrb[6].mxu1 %v25_v63 }
  0xf7   :  { %v217_v0 = vpop.f32.mrb[0].mxu0  ;;  %v229_v1 = vpop.f32.mrb[0].mxu1 }
  0xf8   :  { %v218_v2 = vpop.f32.mrb[1].mxu0  ;;  %v230_v3 = vpop.f32.mrb[1].mxu1 }
  0xf9   :  { %v219_v4 = vadd.f32 %v218_v2, %v217_v0  ;;  %v231_v5 = vadd.f32 %v230_v3, %v229_v1 }
  0xfb   :  { %v164_v6 = vmul.f32 0.25, %v219_v4  ;;  %v168_v7 = vmul.f32 0.25, %v231_v5  ;;  %v220_v8 = vpop.f32.mrb[2].mxu0  ;;  %v232_v9 = vpop.f32.mrb[2].mxu1 }
  0xfc   :  { %v221_v10 = vpop.f32.mrb[3].mxu0  ;;  %v233_v11 = vpop.f32.mrb[3].mxu1 }
  0xfd   :  { %173 = vst.msk [vmem:[%s482_s2] sm:$0xff] %vm172_vm0, %v164_v6  ;;  %177 = vst.msk [vmem:[%s482_s2 + $0x20] sm:$0xff] %vm172_vm0, %v168_v7  ;;  %v222_v12 = vadd.f32 %v221_v10, %v220_v8  ;;  %v234_v13 = vadd.f32 %v233_v11, %v232_v9 }
  0xff   :  { %v165_v14 = vmul.f32 0.25, %v222_v12  ;;  %v169_v15 = vmul.f32 0.25, %v234_v13  ;;  %v223_v16 = vpop.f32.mrb[4].mxu0  ;;  %v235_v17 = vpop.f32.mrb[4].mxu1 }
 0x100   :  { %v224_v18 = vpop.f32.mrb[5].mxu0  ;;  %v236_v19 = vpop.f32.mrb[5].mxu1 }
 0x101   :  { %174 = vst.msk [vmem:[%s482_s2 + $0x8] sm:$0xff] %vm172_vm0, %v165_v14  ;;  %178 = vst.msk [vmem:[%s482_s2 + $0x28] sm:$0xff] %vm172_vm0, %v169_v15  ;;  %v225_v20 = vadd.f32 %v224_v18, %v223_v16  ;;  %v237_v21 = vadd.f32 %v236_v19, %v235_v17 }
 0x103   :  { %v166_v22 = vmul.f32 0.25, %v225_v20  ;;  %v170_v23 = vmul.f32 0.25, %v237_v21  ;;  %v226_v24 = vpop.f32.mrb[6].mxu0  ;;  %v238_v25 = vpop.f32.mrb[6].mxu1 }
 0x104   :  { %v227_v26 = vpop.f32.mrb[7].mxu0  ;;  %v239_v27 = vpop.f32.mrb[7].mxu1 }
 0x105   :  { %175 = vst.msk [vmem:[%s482_s2 + $0x10] sm:$0xff] %vm172_vm0, %v166_v22  ;;  %179 = vst.msk [vmem:[%s482_s2 + $0x30] sm:$0xff] %vm172_vm0, %v170_v23  ;;  %v228_v28 = vadd.f32 %v227_v26, %v226_v24  ;;  %v240_v29 = vadd.f32 %v239_v27, %v238_v25 }
 0x107   :  { %v167_v30 = vmul.f32 0.25, %v228_v28  ;;  %v171_v31 = vmul.f32 0.25, %v240_v29 }
 0x109   :  { %176 = vst.msk [vmem:[%s482_s2 + $0x18] sm:$0xff] %vm172_vm0, %v167_v30  ;;  %180 = vst.msk [vmem:[%s482_s2 + $0x38] sm:$0xff] %vm172_vm0, %v171_v31 }

</bundles_post_ra>
